<compile_context>
chip_gen: v5e
topology: v5e:2x2
jax: 0.10.0
libtpu: 0.0.40
codegen_flags: <defaults>
</compile_context>

<pallas_src>
import functools
import math

import jax
import jax.numpy as jnp
import numpy as np
from jax.experimental import pallas as pl
from jax.experimental.pallas import tpu as pltpu


_MASK_VALUE = -1e30                      # large finite negative: no NaN rows
_LINEAR_VMEM_LIMIT = 28 * 1024 * 1024    # fits v5e/v6e/v7x scoped VMEM


def _choose_tile(dim, target):
    """Largest divisor of `dim` that is <= target (whole dim when small)."""
    if dim <= target:
        return dim
    for cand in range(target, 0, -1):
        if dim % cand == 0:
            return cand
    return dim


# --------------------------- tiled linear kernels ---------------------------

def _matmul_kernel(x_ref, w_ref, o_ref, acc_ref):
    # x: (tm, tk), w: (tk, tn) -> o: (tm, tn); bf16 MXU operands, f32 acc.
    @pl.when(pl.program_id(2) == 0)
    def _():
        acc_ref[...] = jnp.zeros_like(acc_ref)

    acc_ref[...] += jnp.dot(
        x_ref[...].astype(jnp.bfloat16),
        w_ref[...].astype(jnp.bfloat16),
        preferred_element_type=jnp.float32,
    )

    @pl.when(pl.program_id(2) == pl.num_programs(2) - 1)
    def _():
        o_ref[...] = acc_ref[...].astype(o_ref.dtype)


def pallas_linear(x, w, *, tm=512, tn=512, tk=1024):
    """x: (M, K) @ w: (K, N) -> (M, N).  Tiled + pipelined, f32 accumulation."""
    M, K = x.shape
    K2, N = w.shape
    assert K == K2
    tm, tn, tk = _choose_tile(M, tm), _choose_tile(N, tn), _choose_tile(K, tk)
    return pl.pallas_call(
        _matmul_kernel,
        out_shape=jax.ShapeDtypeStruct((M, N), x.dtype),
        grid=(M // tm, N // tn, K // tk),
        in_specs=[
            pl.BlockSpec((tm, tk), lambda i, j, k: (i, k)),
            pl.BlockSpec((tk, tn), lambda i, j, k: (k, j)),
        ],
        out_specs=pl.BlockSpec((tm, tn), lambda i, j, k: (i, j)),
        scratch_shapes=[pltpu.VMEM((tm, tn), jnp.float32)],
        compiler_params=pltpu.CompilerParams(
            dimension_semantics=("parallel", "parallel", "arbitrary"),
            vmem_limit_bytes=_LINEAR_VMEM_LIMIT,
        ),
    )(x, w)


def _matmul_rmsnorm_kernel(x_ref, w_ref, g_ref, o_ref, acc_ref, *, eps):
    # Fused: o = g * RMSNorm(x @ w).  N is un-tiled (norm needs the full row).
    @pl.when(pl.program_id(1) == 0)
    def _():
        acc_ref[...] = jnp.zeros_like(acc_ref)

    acc_ref[...] += jnp.dot(
        x_ref[...].astype(jnp.bfloat16),
        w_ref[...].astype(jnp.bfloat16),
        preferred_element_type=jnp.float32,
    )

    @pl.when(pl.program_id(1) == pl.num_programs(1) - 1)
    def _():
        y = acc_ref[...]                                     # (tm, N) f32
        rms = jnp.sqrt(jnp.mean(y * y, axis=-1, keepdims=True))
        inv = pl.reciprocal(rms + eps, approx=True)          # EUP, ~free
        o_ref[...] = (g_ref[...] * (y * inv)).astype(o_ref.dtype)


def pallas_linear_rmsnorm(x, w, gamma, *, eps=1e-6, tm=512, tk=1024):
    """g * RMSNorm(x @ w), matching DeepseekV2RMSNorm: y / (sqrt(mean(y^2)) + eps)."""
    M, K = x.shape
    K2, N = w.shape
    assert K == K2 and gamma.shape == (N,)
    tm, tk = _choose_tile(M, tm), _choose_tile(K, tk)
    return pl.pallas_call(
        functools.partial(_matmul_rmsnorm_kernel, eps=eps),
        out_shape=jax.ShapeDtypeStruct((M, N), x.dtype),
        grid=(M // tm, K // tk),
        in_specs=[
            pl.BlockSpec((tm, tk), lambda i, k: (i, k)),
            pl.BlockSpec((tk, N), lambda i, k: (k, 0)),
            pl.BlockSpec((1, N), lambda i, k: (0, 0)),
        ],
        out_specs=pl.BlockSpec((tm, N), lambda i, k: (i, 0)),
        scratch_shapes=[pltpu.VMEM((tm, N), jnp.float32)],
        compiler_params=pltpu.CompilerParams(
            dimension_semantics=("parallel", "arbitrary"),
            vmem_limit_bytes=_LINEAR_VMEM_LIMIT,
        ),
    )(x, w, gamma.reshape(1, N))


# ------------------------- flash attention (causal) -------------------------

def _flash_attn_kernel(qn_ref, qr_ref, kn_ref, kr_ref, v_ref, o_ref,
                       m_sc, l_sc, acc_sc, *, scale, tq, tk):
    qi = pl.program_id(1)
    ki = pl.program_id(2)
    q_start = qi * tq
    k_start = ki * tk

    @pl.when(ki == 0)
    def _():
        m_sc[...] = jnp.full_like(m_sc, -jnp.inf)
        l_sc[...] = jnp.zeros_like(l_sc)
        acc_sc[...] = jnp.zeros_like(acc_sc)

    # Skip kv tiles entirely above the causal diagonal (halves causal FLOPs).
    @pl.when(k_start <= q_start + (tq - 1))
    def _():
        # 1/sqrt(Dq) folded into Q; bf16 MXU operands, f32 accumulation;
        # score = nope-contraction + rope-contraction (no concat, no k.T).
        qn = (qn_ref[...] * scale).astype(jnp.bfloat16)
        qr = (qr_ref[...] * scale).astype(jnp.bfloat16)
        contract_last = (((1,), (1,)), ((), ()))
        s = jax.lax.dot_general(qn, kn_ref[...].astype(jnp.bfloat16),
                                contract_last,
                                preferred_element_type=jnp.float32)
        s += jax.lax.dot_general(qr, kr_ref[...].astype(jnp.bfloat16),
                                 contract_last,
                                 preferred_element_type=jnp.float32)

        row = q_start + jax.lax.broadcasted_iota(jnp.int32, (tq, tk), 0)
        col = k_start + jax.lax.broadcasted_iota(jnp.int32, (tq, tk), 1)
        s = jnp.where(col <= row, s, _MASK_VALUE)

        m_prev = m_sc[...]
        m_new = jnp.maximum(m_prev, jnp.max(s, axis=-1, keepdims=True))
        alpha = jnp.exp(m_prev - m_new)
        p = jnp.exp(s - m_new)
        l_sc[...] = alpha * l_sc[...] + jnp.sum(p, axis=-1, keepdims=True)
        acc_sc[...] = alpha * acc_sc[...] + jax.lax.dot_general(
            p.astype(jnp.bfloat16), v_ref[...].astype(jnp.bfloat16),
            (((1,), (0,)), ((), ())), preferred_element_type=jnp.float32)
        m_sc[...] = m_new

    @pl.when(ki == pl.num_programs(2) - 1)
    def _():
        inv_l = pl.reciprocal(l_sc[...], approx=True)
        o_ref[...] = (acc_sc[...] * inv_l).astype(o_ref.dtype)


def pallas_flash_attention(q_nope, q_rope, k_nope, k_rope, v, *,
                           num_head, scale, tile=128):
    """Causal flash attention.

    q_nope/q_rope/k_nope/v: (B*H, S, d); k_rope: (B, S, rope) shared across
    heads (the BlockSpec index_map does the broadcast, not HBM).
    """
    BH, S, nope = q_nope.shape
    rope = q_rope.shape[-1]
    dv = v.shape[-1]
    t = _choose_tile(S, tile)            # tq == tk (keeps every computed
    n_t = S // t                         # diagonal-tile row non-empty)
    return pl.pallas_call(
        functools.partial(_flash_attn_kernel, scale=scale, tq=t, tk=t),
        out_shape=jax.ShapeDtypeStruct((BH, S, dv), q_nope.dtype),
        grid=(BH, n_t, n_t),
        in_specs=[
            pl.BlockSpec((None, t, nope), lambda bh, qi, ki: (bh, qi, 0)),
            pl.BlockSpec((None, t, rope), lambda bh, qi, ki: (bh, qi, 0)),
            pl.BlockSpec((None, t, nope), lambda bh, qi, ki: (bh, ki, 0)),
            pl.BlockSpec((None, t, rope),
                         lambda bh, qi, ki: (bh // num_head, ki, 0)),
            pl.BlockSpec((None, t, dv), lambda bh, qi, ki: (bh, ki, 0)),
        ],
        out_specs=pl.BlockSpec((None, t, dv), lambda bh, qi, ki: (bh, qi, 0)),
        scratch_shapes=[
            pltpu.VMEM((t, 1), jnp.float32),
            pltpu.VMEM((t, 1), jnp.float32),
            pltpu.VMEM((t, dv), jnp.float32),
        ],
        compiler_params=pltpu.CompilerParams(
            dimension_semantics=("parallel", "parallel", "arbitrary")),
    )(q_nope, q_rope, k_nope, k_rope, v)


# ------------- debug-only: materialized attention probabilities -------------

def _attn_weights_kernel(qn_ref, qr_ref, kn_ref, kr_ref, w_ref, *, scale):
    qn = qn_ref[...].astype(jnp.float32) * scale
    qr = qr_ref[...].astype(jnp.float32) * scale
    contract_last = (((1,), (1,)), ((), ()))
    s = jax.lax.dot_general(qn, kn_ref[...].astype(jnp.float32),
                            contract_last, preferred_element_type=jnp.float32)
    s += jax.lax.dot_general(qr, kr_ref[...].astype(jnp.float32),
                             contract_last, preferred_element_type=jnp.float32)
    S = s.shape[0]
    row = jax.lax.broadcasted_iota(jnp.int32, (S, S), 0)
    col = jax.lax.broadcasted_iota(jnp.int32, (S, S), 1)
    s = jnp.where(col <= row, s, _MASK_VALUE)
    m = jnp.max(s, axis=-1, keepdims=True)
    e = jnp.exp(s - m)
    inv = pl.reciprocal(jnp.sum(e, axis=-1, keepdims=True), approx=True)
    w_ref[...] = (e * inv).astype(w_ref.dtype)


def pallas_attention_weights(q_nope, q_rope, k_nope, k_rope, *, num_head, scale):
    """Debug-only: full (S, S) softmax probabilities per (batch, head).
    Not part of the hot path (O(S^2) HBM writes); only call at small S."""
    BH, S, nope = q_nope.shape
    rope = q_rope.shape[-1]
    return pl.pallas_call(
        functools.partial(_attn_weights_kernel, scale=scale),
        out_shape=jax.ShapeDtypeStruct((BH, S, S), jnp.float32),
        grid=(BH,),
        in_specs=[
            pl.BlockSpec((None, S, nope), lambda bh: (bh, 0, 0)),
            pl.BlockSpec((None, S, rope), lambda bh: (bh, 0, 0)),
            pl.BlockSpec((None, S, nope), lambda bh: (bh, 0, 0)),
            pl.BlockSpec((None, S, rope), lambda bh: (bh // num_head, 0, 0)),
        ],
        out_specs=pl.BlockSpec((None, S, S), lambda bh: (bh, 0, 0)),
        compiler_params=pltpu.CompilerParams(
            dimension_semantics=("parallel",)),
    )(q_nope, q_rope, k_nope, k_rope)


# --------------------------------- JAX glue ---------------------------------

def make_rope_cache(dim, max_pos, base):
    inv_freq = 1.0 / (base ** (jnp.arange(0, dim, 2, dtype=jnp.float32) / dim))
    t = jnp.arange(max_pos, dtype=jnp.float32)
    freqs = jnp.outer(t, inv_freq)
    emb = jnp.concatenate([freqs, freqs], axis=-1)
    return jnp.cos(emb), jnp.sin(emb)


def _rotate_half(x):
    d = x.shape[-1]
    return jnp.concatenate([-x[..., d // 2:], x[..., :d // 2]], axis=-1)


def apply_rotary_pos_emb(q, k, cos, sin, position_ids):
    # cos/sin: (max_pos, d); position_ids: (B, S)
    cos = cos[position_ids][:, None, :, :]     # (B, 1, S, d)
    sin = sin[position_ids][:, None, :, :]

    def deinterleave(x):
        # view(..., d//2, 2).transpose(-1, -2).reshape(..., d)
        return jnp.concatenate([x[..., 0::2], x[..., 1::2]], axis=-1)

    q = deinterleave(q)
    k = deinterleave(k)
    q_embed = q * cos + _rotate_half(q) * sin
    k_embed = k * cos + _rotate_half(k) * sin
    return q_embed, k_embed


def mla_forward(params, cfg, hidden_states, position_ids, use_pallas=True,
                return_attn_weights=False):
    B, S, H = hidden_states.shape
    nh = cfg["num_head"]
    nope = cfg["qk_nope_head_dim"]
    rope = cfg["qk_rope_head_dim"]
    vdim = cfg["v_head_dim"]
    Dq = nope + rope
    scale = 1.0 / math.sqrt(Dq)

    x2d = hidden_states.reshape(B * S, H)

    if use_pallas:
        # Q path: down-proj with fused RMSNorm epilogue, then up-proj.
        q_down = pallas_linear_rmsnorm(x2d, params["q_down_w"],
                                       params["q_down_norm_w"])
        q = pallas_linear(q_down, params["q_up_w"])
        # KV path: split the down-proj weight columns so RMSNorm fuses into
        # the latent projection (identical to project-then-split).
        w_kr = params["kv_down_w"][:, :rope]
        w_kv = params["kv_down_w"][:, rope:]
        k_rope_2d = pallas_linear(x2d, w_kr)                     # (B*S, rope)
        kv_hidden = pallas_linear_rmsnorm(x2d, w_kv,
                                          params["kv_down_norm_w"])
        kv_up = pallas_linear(kv_hidden, params["kv_up_w"])
    else:
        def rmsnorm(x, w, eps=1e-6):
            xf = x.astype(jnp.float32)
            rms = jnp.sqrt(jnp.mean(xf * xf, axis=-1, keepdims=True))
            return (w * (xf / (rms + eps))).astype(x.dtype)

        q_down = rmsnorm(jnp.dot(x2d, params["q_down_w"]),
                         params["q_down_norm_w"])
        q = jnp.dot(q_down, params["q_up_w"])
        kv_down = jnp.dot(x2d, params["kv_down_w"])
        k_rope_2d = kv_down[:, :rope]
        kv_hidden = rmsnorm(kv_down[:, rope:], params["kv_down_norm_w"])
        kv_up = jnp.dot(kv_hidden, params["kv_up_w"])

    q4 = q.reshape(B, S, nh, Dq).transpose(0, 2, 1, 3)           # (B, nh, S, Dq)
    q_nope, q_rope = q4[..., :nope], q4[..., nope:]
    k_rope = k_rope_2d.reshape(B, 1, S, rope)
    kv4 = kv_up.reshape(B, S, nh, nope + vdim).transpose(0, 2, 1, 3)
    k_nope, V = kv4[..., :nope], kv4[..., nope:]

    cos, sin = params["rope_cos"][:S], params["rope_sin"][:S]
    q_rope, k_rope = apply_rotary_pos_emb(q_rope, k_rope, cos, sin, position_ids)

    if use_pallas:
        qn = q_nope.reshape(B * nh, S, nope)
        qr = q_rope.reshape(B * nh, S, rope)
        kn = k_nope.reshape(B * nh, S, nope)
        kr = k_rope.reshape(B, S, rope)          # shared across heads
        v3 = V.reshape(B * nh, S, vdim)

        ctx = pallas_flash_attention(qn, qr, kn, kr, v3,
                                     num_head=nh, scale=scale)
        ctx = ctx.reshape(B, nh, S, vdim)
        attn_w = None
        if return_attn_weights:
            attn_w = pallas_attention_weights(
                qn, qr, kn, kr, num_head=nh, scale=scale).reshape(B, nh, S, S)
    else:
        Q = jnp.concatenate([q_nope, q_rope], axis=-1)
        K = jnp.concatenate(
            [k_nope, jnp.broadcast_to(k_rope, (B, nh, S, rope))], axis=-1)
        s = jnp.einsum("bhqd,bhkd->bhqk", Q, K) * scale
        mask = jnp.tril(jnp.ones((S, S), dtype=bool))
        s = jnp.where(mask[None, None], s, -jnp.inf)
        attn_w = jax.nn.softmax(s, axis=-1)
        ctx = jnp.einsum("bhqk,bhkd->bhqd", attn_w, V)

    out2d = ctx.transpose(0, 2, 1, 3).reshape(B * S, nh * vdim)
    if use_pallas:
        out = pallas_linear(out2d, params["out_w"])
    else:
        out = jnp.dot(out2d, params["out_w"])
    return out.reshape(B, S, H), attn_w


# ----------------------------- params / main --------------------------------

def init_params(key, cfg):
    H = cfg["hidden_dim"]
    nh = cfg["num_head"]
    nope, rope = cfg["qk_nope_head_dim"], cfg["qk_rope_head_dim"]
    vdim = cfg["v_head_dim"]
    q_lora, kv_lora = cfg["q_lora_rank"], cfg["kv_lora_rank"]

    ks = jax.random.split(key, 5)
    std = 0.02
    # Weights stored in (in_features, out_features) layout, i.e. the
    # pre-transposed nn.Linear weight, so no transposes on the forward path.
    params = {
        "q_down_w": jax.random.normal(ks[0], (H, q_lora), jnp.float32) * std,
        "q_down_norm_w": jnp.ones((q_lora,), jnp.float32),
        "kv_down_w": jax.random.normal(ks[1], (H, rope + kv_lora), jnp.float32) * std,
        "kv_down_norm_w": jnp.ones((kv_lora,), jnp.float32),
        "q_up_w": jax.random.normal(ks[2], (q_lora, nh * (nope + rope)), jnp.float32) * std,
        "kv_up_w": jax.random.normal(ks[3], (kv_lora, nh * (nope + vdim)), jnp.float32) * std,
        "out_w": jax.random.normal(ks[4], (nh * vdim, H), jnp.float32) * std,
    }
    cos, sin = make_rope_cache(rope, cfg["max_position_embeddings"], cfg["rope_theta"])
    params["rope_cos"] = cos
    params["rope_sin"] = sin
    return params


if __name__ == "__main__":
    # Small config consistent with the module structure.
    cfg = dict(
        hidden_dim=32,
        num_head=2,
        max_position_embeddings=32,
        rope_theta=10000,
        q_lora_rank=16,
        qk_rope_head_dim=8,
        kv_lora_rank=16,
        v_head_dim=16,
        qk_nope_head_dim=16,
    )
    B, S = 2, 8

    key = jax.random.PRNGKey(0)
    kp, kx = jax.random.split(key)
    params = init_params(kp, cfg)
    hidden_states = jax.random.normal(kx, (B, S, cfg["hidden_dim"]), jnp.float32)
    position_ids = jnp.broadcast_to(jnp.arange(S, dtype=jnp.int32), (B, S))

    out, attn_w = mla_forward(params, cfg, hidden_states, position_ids,
                              use_pallas=True, return_attn_weights=True)
    out = jax.block_until_ready(out)
    attn_w = jax.block_until_ready(attn_w)

    # Correctness check against a pure-JAX f32 reference of the same forward.
    ref_out, ref_w = mla_forward(params, cfg, hidden_states, position_ids,
                                 use_pallas=False, return_attn_weights=True)
    np.testing.assert_allclose(np.asarray(out), np.asarray(ref_out),
                               rtol=2e-2, atol=2e-2)
    np.testing.assert_allclose(np.asarray(attn_w), np.asarray(ref_w),
                               rtol=2e-2, atol=2e-2)

    assert out.shape == (B, S, cfg["hidden_dim"])
    assert attn_w.shape == (B, cfg["num_head"], S, S)
    print("KERNEL_OK")
</pallas_src>

<mosaic_0001>
module attributes {stable_mosaic.version = 11 : i64} {
  func.func @_matmul_rmsnorm_kernel(%arg0: i32, %arg1: i32, %arg2: memref<16x32xf32, #tpu.memory_space<vmem>>, %arg3: memref<32x16xf32, #tpu.memory_space<vmem>>, %arg4: memref<1x16xf32, #tpu.memory_space<vmem>>, %arg5: memref<16x16xf32, #tpu.memory_space<vmem>>, %arg6: memref<16x16xf32, #tpu.memory_space<vmem>>) attributes {dimension_semantics = [#tpu.dimension_semantics<parallel>, #tpu.dimension_semantics<arbitrary>], iteration_bounds = array<i64: 1, 1>, scalar_prefetch = 0 : i64, scratch_operands = 1 : i64, tpu.core_type = #tpu.core_type<tc>, window_params = [{transform_indices = @transform_0, window_bounds = array<i64: 16, 32>}, {transform_indices = @transform_1, window_bounds = array<i64: 32, 16>}, {pipeline_mode = #tpu.pipeline_mode<synchronous>, transform_indices = @transform_2, window_bounds = array<i64: 1, 16>}, {transform_indices = @transform_3, window_bounds = array<i64: 16, 16>}]} {
    %c0_i32 = arith.constant 0 : i32
    %0 = arith.cmpi eq, %arg1, %c0_i32 : i32
    %1 = arith.extui %0 : i1 to i32
    %c0_i32_0 = arith.constant 0 : i32
    %2 = arith.cmpi ne, %1, %c0_i32_0 : i32
    scf.if %2 {
      %cst_10 = arith.constant 0.000000e+00 : f32
      %14 = vector.broadcast %cst_10 : f32 to vector<16x16xf32>
      %c0_11 = arith.constant 0 : index
      %c0_12 = arith.constant 0 : index
      %15 = vector.load %arg6[%c0_11, %c0_12] : memref<16x16xf32, #tpu.memory_space<vmem>>, vector<16x16xf32>
      tpu.vector_store %arg6[%c0_11, %c0_12], %14 {strides = array<i32>} : memref<16x16xf32, #tpu.memory_space<vmem>>, vector<16x16xf32>,
    } else {
    }
    %c0 = arith.constant 0 : index
    %c0_1 = arith.constant 0 : index
    %3 = vector.load %arg6[%c0, %c0_1] : memref<16x16xf32, #tpu.memory_space<vmem>>, vector<16x16xf32>
    %c0_2 = arith.constant 0 : index
    %c0_3 = arith.constant 0 : index
    %4 = vector.load %arg2[%c0_2, %c0_3] : memref<16x32xf32, #tpu.memory_space<vmem>>, vector<16x32xf32>
    %5 = arith.truncf %4 : vector<16x32xf32> to vector<16x32xbf16>
    %c0_4 = arith.constant 0 : index
    %c0_5 = arith.constant 0 : index
    %6 = vector.load %arg3[%c0_4, %c0_5] : memref<32x16xf32, #tpu.memory_space<vmem>>, vector<32x16xf32>
    %7 = arith.truncf %6 : vector<32x16xf32> to vector<32x16xbf16>
    %cst = arith.constant dense<0.000000e+00> : vector<16x16xf32>
    %8 = tpu.matmul %5, %7, %cst {dimension_numbers = #tpu.dot_dimension_numbers<[1], [0], [0], [1], [0, 0, 1, 1], [], []>} : vector<16x32xbf16>, vector<32x16xbf16>, vector<16x16xf32> -> vector<16x16xf32>
    %9 = arith.addf %3, %8 : vector<16x16xf32>
    %c0_6 = arith.constant 0 : index
    %c0_7 = arith.constant 0 : index
    %10 = vector.load %arg6[%c0_6, %c0_7] : memref<16x16xf32, #tpu.memory_space<vmem>>, vector<16x16xf32>
    tpu.vector_store %arg6[%c0_6, %c0_7], %9 {strides = array<i32>} : memref<16x16xf32, #tpu.memory_space<vmem>>, vector<16x16xf32>,
    %c0_i32_8 = arith.constant 0 : i32
    %11 = arith.cmpi eq, %arg1, %c0_i32_8 : i32
    %12 = arith.extui %11 : i1 to i32
    %c0_i32_9 = arith.constant 0 : i32
    %13 = arith.cmpi ne, %12, %c0_i32_9 : i32
    scf.if %13 {
      %c0_10 = arith.constant 0 : index
      %c0_11 = arith.constant 0 : index
      %14 = vector.load %arg6[%c0_10, %c0_11] : memref<16x16xf32, #tpu.memory_space<vmem>>, vector<16x16xf32>
      %15 = arith.mulf %14, %14 : vector<16x16xf32>
      %cst_12 = arith.constant dense<0.000000e+00> : vector<16xf32>
      %16 = vector.multi_reduction <add>, %15, %cst_12 [1] : vector<16x16xf32> to vector<16xf32>
      %17 = vector.shape_cast %16 : vector<16xf32> to vector<16x1xf32>
      %cst_13 = arith.constant 1.600000e+01 : f32
      %18 = vector.broadcast %cst_13 : f32 to vector<16x1xf32>
      %19 = arith.divf %17, %18 : vector<16x1xf32>
      %20 = math.sqrt %19 : vector<16x1xf32>
      %cst_14 = arith.constant 9.99999997E-7 : f32
      %21 = vector.broadcast %cst_14 : f32 to vector<16x1xf32>
      %22 = arith.addf %20, %21 : vector<16x1xf32>
      %23 = tpu.reciprocal %22 {approx = true} : vector<16x1xf32> -> vector<16x1xf32>
      %c0_15 = arith.constant 0 : index
      %c0_16 = arith.constant 0 : index
      %24 = vector.load %arg4[%c0_15, %c0_16] : memref<1x16xf32, #tpu.memory_space<vmem>>, vector<1x16xf32>
      %25 = vector.broadcast %23 : vector<16x1xf32> to vector<16x16xf32>
      %26 = arith.mulf %14, %25 : vector<16x16xf32>
      %27 = vector.broadcast %24 : vector<1x16xf32> to vector<16x16xf32>
      %28 = arith.mulf %27, %26 : vector<16x16xf32>
      %c0_17 = arith.constant 0 : index
      %c0_18 = arith.constant 0 : index
      %29 = vector.load %arg5[%c0_17, %c0_18] : memref<16x16xf32, #tpu.memory_space<vmem>>, vector<16x16xf32>
      tpu.vector_store %arg5[%c0_17, %c0_18], %28 {strides = array<i32>} : memref<16x16xf32, #tpu.memory_space<vmem>>, vector<16x16xf32>,
    } else {
    }
    return
  }
  func.func @transform_0(%arg0: i32, %arg1: i32) -> (i32, i32) {
    %c0_i32 = arith.constant 0 : i32
    return %arg0, %arg1 : i32, i32
  }
  func.func @transform_1(%arg0: i32, %arg1: i32) -> (i32, i32) {
    %c0_i32 = arith.constant 0 : i32
    %c0_i32_0 = arith.constant 0 : i32
    return %arg1, %c0_i32 : i32, i32
  }
  func.func @transform_2(%arg0: i32, %arg1: i32) -> (i32, i32) {
    %c0_i32 = arith.constant 0 : i32
    %c0_i32_0 = arith.constant 0 : i32
    %c0_i32_1 = arith.constant 0 : i32
    return %c0_i32, %c0_i32_0 : i32, i32
  }
  func.func @transform_3(%arg0: i32, %arg1: i32) -> (i32, i32) {
    %c0_i32 = arith.constant 0 : i32
    %c0_i32_0 = arith.constant 0 : i32
    return %arg0, %c0_i32 : i32, i32
  }
}

</mosaic_0001>

<bundles_post_ra>
// kernel: tpu_custom_call.1
= control target key start
LH: loop header
LB: loop body
LE: loop exit
PB: predicated region body
PF: predicated region fallthrough
CT: control target
= control target key end

     0   :  { %vm20_vm0 = vcmask 130048   ;;  %v178_v5 = vmov 0.0   ;;  %s235_s0 = inlined_call_operand.vmem [shape: f32[16,32], index: 0, kind: input, shape index: {}]   ;;  %s236_s1 = inlined_call_operand.vmem [shape: f32[32,16], index: 1, kind: input, shape index: {}]   ;;  %s237_s2 = inlined_call_operand.vmem [shape: f32[1,16], index: 2, kind: input, shape index: {}]   ;;  %s238_s3 = inlined_call_operand.hbm [shape: f32[16,16], index: 3, kind: output, shape index: {}]  }
   0x1   :  { %v30_v0 = vld [vmem:[%s236_s1 + $0x10] sm:$0xff]  ;;  %v31_v1 = vld [vmem:[%s236_s1 + $0x18] sm:$0xff]  ;;  %v28_v2 = vld [vmem:[%s236_s1] sm:$0xff]  ;;  %21 = vst.msk [vmem:[#allocation2] sm:$0xff] %vm20_vm0, %v178_v5 }
   0x2   :  { %v33_v3 = vpack.c.bf16 %v31_v1, %v30_v0  ;;  %v29_v4 = vld [vmem:[%s236_s1 + $0x8] sm:$0xff]  ;;  %22 = vst.msk [vmem:[#allocation2 + $0x8] sm:$0xff] %vm20_vm0, %v178_v5 }
   0x3   :  { %8 = vsyncpa [#allocation4], 0  ;;  %v32_v6 = vpack.c.bf16 %v29_v4, %v28_v2  ;;  %v25_v7 = vld [vmem:[%s235_s0] sm:$0xff]  ;;  %v26_v8 = vld [vmem:[%s235_s0 + $0x8] sm:$0xff]  ;;  %vm34_vm1 = vcmask 261120   ;;  %v179_v22 = vmov 16.0  }
   0x4   :  { %44 = vmatpush.bf16.msra.mxu0 %v33_v3  ;;  %v27_v9 = vpack.c.bf16 %v26_v8, %v25_v7  ;;  %142 = vrcp.f32 %v179_v22  ;;  %v141_v54 = vld [vmem:[%s237_s2] ss:$0 sm:$0xff]  ;;  %s180_s24 = smov [#allocation3]   ;;  %s123_s28 = sshll.u32 %s238_s3, 4  ;;  %s124_s28 = int_to_ptr.hbm [resolvable:$true] %s123_s28 }
   0x5   :  { %s121_s25 = sshll.u32 %s180_s24, 4  ;;  %s181_s2 = smov 128   ;;  %s122_s25 = int_to_ptr.vmem [resolvable:$true] %s121_s25 }
   0x6   :  { %s182_s29 = smov 8  }
   0x8   :  { %45 = vmatpush.bf16.msra.mxu0 %v32_v6  ;;  %v23_v10 = vld [vmem:[#allocation2] sm:$0xff] }
   0x9   :  { %v24_v13 = vld [vmem:[#allocation2 + $0x8] sm:$0xff] }
   0xa   :  { %v143_v23 = vpop.eup %142 }
   0xb   :  { %135 = vmatmul.msk.bf16.vlgmr.msra.gmra.mxu0 %vm34_vm1, %v27_v9  ;;  %v71_v24 = vmul.f32 16.0, %v143_v23  ;;  %vm75_vm2 = vweird.f32 %v143_v23 }
   0xd   :  { %v72_v25 = vsub.f32 1.0, %v71_v24 }
   0xf   :  { %v73_v26 = vmul.f32 %v143_v23, %v72_v25 }
  0x11   :  { %v74_v27 = vadd.f32 %v143_v23, %v73_v26 }
  0x13   :  { %v76_v28 = vsel %vm75_vm2, %v143_v23, %v74_v27 }
  0x88   :  { %v47_v11 = vpop.f32.mrf.mxu0 }
  0x89   :  { %v52_v12 = vadd.f32 %v47_v11, %v23_v10 }
  0x8b   :  { %55 = vst.msk [vmem:[#allocation2] sm:$0xff] %vm20_vm0, %v52_v12 }
  0x90   :  { %v49_v14 = vpop.f32.mrf.mxu0 }
  0x91   :  { %v53_v15 = vadd.f32 %v49_v14, %v24_v13 }
  0x92   :  { %v60_v16 = vld [vmem:[#allocation2] sm:$0xff] }
  0x93   :  { %56 = vst.msk [vmem:[#allocation2 + $0x8] sm:$0xff] %vm20_vm0, %v53_v15  ;;  %v62_v17 = vmul.f32 %v60_v16, %v60_v16 }
  0x95   :  { %v64_v18 = vsel %vm20_vm0, %v62_v17, 0.0 }
  0x96   :  { %65 = vadd.xlane.f32.xlu0 %v64_v18 }
  0x9a   :  { %v61_v19 = vld [vmem:[#allocation2 + $0x8] sm:$0xff] }
  0x9b   :  { %v63_v20 = vmul.f32 %v61_v19, %v61_v19 }
  0x9d   :  { %v67_v21 = vsel %vm20_vm0, %v63_v20, 0.0 }
  0x9e   :  { %68 = vadd.xlane.f32.xlu0 %v67_v21 }
 0x109   :  { %v66_v29 = vpop.xlane.xlu0 %65 }
 0x10a   :  { %v77_v30 = vmul.f32 %v76_v28, %v66_v29 }
 0x10c   :  { %144 = vrsqrt.f32 %v77_v30  ;;  %vm86_vm3 = vcmp.eq.f32.partialorder %v77_v30, inf  ;;  %v89_v43 = vand.u32 2147483648, %v77_v30  ;;  %vm88_vm4 = vcmp.eq.f32.partialorder %v77_v30, 0.0 }
 0x111   :  { %v69_v31 = vpop.xlane.xlu0 %68 }
 0x112   :  { %v145_v32 = vpop.eup %144  ;;  %v78_v33 = vmul.f32 %v76_v28, %v69_v31 }
 0x113   :  { %v80_v34 = vmul.f32 %v145_v32, %v77_v30 }
 0x114   :  { %146 = vrsqrt.f32 %v78_v33  ;;  %vm98_vm5 = vcmp.eq.f32.partialorder %v78_v33, inf  ;;  %v101_v51 = vand.u32 2147483648, %v78_v33  ;;  %vm100_vm6 = vcmp.eq.f32.partialorder %v78_v33, 0.0 }
 0x115   :  { %v81_v35 = vmul.f32 %v145_v32, %v80_v34 }
 0x117   :  { %v82_v36 = vmul.f32 0.5, %v81_v35 }
 0x119   :  { %v83_v37 = vsub.f32 1.5, %v82_v36 }
 0x11a   :  { %v147_v38 = vpop.eup %146 }
 0x11b   :  { %v84_v39 = vmul.f32 %v145_v32, %v83_v37  ;;  %v92_v40 = vmul.f32 %v147_v38, %v78_v33 }
 0x11d   :  { %v85_v41 = vmul.f32 %v84_v39, %v77_v30  ;;  %v93_v42 = vmul.f32 %v147_v38, %v92_v40 }
 0x11f   :  { %v87_v44 = vsel %vm86_vm3, %v77_v30, %v85_v41  ;;  %v94_v45 = vmul.f32 0.5, %v93_v42 }
 0x120   :  { %v90_v46 = vsel %vm88_vm4, %v89_v43, %v87_v44 }
 0x121   :  { %v95_v47 = vsub.f32 1.5, %v94_v45  ;;  %v103_v48 = vadd.f32 1e-06, %v90_v46 }
 0x123   :  { %v96_v49 = vmul.f32 %v147_v38, %v95_v47  ;;  %148 = vrcp.f32 %v103_v48 }
 0x125   :  { %v97_v50 = vmul.f32 %v96_v49, %v78_v33 }
 0x127   :  { %v99_v52 = vsel %vm98_vm5, %v78_v33, %v97_v50 }
 0x128   :  { %v102_v53 = vsel %vm100_vm6, %v101_v51, %v99_v52 }
 0x129   :  { %v149_v55 = vpop.eup %148  ;;  %v104_v56 = vadd.f32 1e-06, %v102_v53 }
 0x12a   :  { %v108_v57 = vmul.f32 %v149_v55, %v60_v16 }
 0x12b   :  { %150 = vrcp.f32 %v104_v56 }
 0x12c   :  { %v113_v58 = vmul.f32 %v141_v54, %v108_v57 }
 0x12e   :  { %115 = vst.msk [vmem:[#allocation3] sm:$0xff] %vm20_vm0, %v113_v58 }
 0x131   :  { %v151_v59 = vpop.eup %150 }
 0x132   :  { %v109_v60 = vmul.f32 %v151_v59, %v61_v19 }
 0x134   :  { %v114_v61 = vmul.f32 %v141_v54, %v109_v60 }
 0x136   :  { %116 = vst.msk [vmem:[#allocation3 + $0x8] sm:$0xff] %vm20_vm0, %v114_v61 }
 0x137   :  { %129 = dma.vmem_to_hbm [thread:$0]  %s122_s25, 256, %s124_s28, [#allocation4], %s181_s2, %s181_s2, %s182_s29  }
 0x138   :  { %176 = dma.done.wait [#allocation4], 256  }
 0x139   :  { %177 = vsyncadd [#allocation4], 4294967040 }
 0x13a   :  { %134 = vsyncpa [#allocation4], 1 }

</bundles_post_ra>
